<compile_context>
chip_gen: v7x
topology: tpu7x:2x2x1
jax: 0.10.0
libtpu: 0.0.40
codegen_flags: <defaults>
</compile_context>

<pallas_src>
import jax
import jax.numpy as jnp
from jax.experimental import pallas as pl
from jax.experimental.pallas import tpu as pltpu


def _round_up(x, m):
    return ((x + m - 1) // m) * m


# ----------------------------------------------------------------------------- kernel

def patch_deembed_kernel(x_ref, w_ref, b_ref, o_ref):
    """One (tm, tn) output tile: tokens-tile @ weight-column-tile + bias-column-tile."""
    o_ref[...] = (
        jnp.dot(x_ref[...], w_ref[...], preferred_element_type=jnp.float32)
        + b_ref[...]
    ).astype(o_ref.dtype)


# ---------------------------------------------------------------------------- wrapper

def patch_deembed(tokens, w_de, b_de, *, patch_size, img_size, in_chans,
                  compute_dtype=None, out_dtype=jnp.float32,
                  max_row_tile=1024, max_col_tile=512):
    """PatchDeEmbed forward.

    tokens : (B, N, E)     patch embeddings
    w_de   : (E, C*p*p)    ConvTranspose2d weight reshaped from (E, C, p, p)
    b_de   : (1, C*p*p)    ConvTranspose2d bias, each channel repeated p*p times
    returns: (B, C, H, W)  `out_dtype`
    """
    B, N, E = tokens.shape
    p = patch_size
    Hp = Wp = img_size // p
    assert N == Hp * Wp, (N, Hp, Wp)
    C = in_chans
    KO = C * p * p
    assert w_de.shape == (E, KO), w_de.shape
    assert b_de.shape == (1, KO), b_de.shape

    M = B * N
    x2 = tokens.reshape(M, E)

    # Opt-in only: a wrapper-side f32->bf16 cast is a separate full HBM pass over the
    # tokens and is a net traffic regression when the kernel is memory-bound. Only use
    # it (or hand bf16 tokens in directly) when E/KO are large enough to be MXU-bound.
    if compute_dtype is not None:
        x2 = x2.astype(compute_dtype)
        w_de = w_de.astype(compute_dtype)

    itemsize = jnp.dtype(x2.dtype).itemsize
    out_itemsize = jnp.dtype(out_dtype).itemsize
    row_align = 8 if itemsize >= 4 else 16

    # --- pad output columns to a multiple of 128 -> lane-dense, unmasked stores.
    KOp = _round_up(KO, 128)
    if KOp != KO:
        w_de = jnp.pad(w_de, ((0, 0), (0, KOp - KO)))
        b_de = jnp.pad(b_de, ((0, 0), (0, KOp - KO)))

    # --- VMEM budget: real per-core capacity with headroom (v7x = 64 MiB/TC).
    vmem_cap = 64 * 1024 * 1024
    try:
        info = pltpu.get_tpu_info()
        vmem_cap = int(getattr(info, "vmem_capacity_bytes", vmem_cap)) or vmem_cap
    except Exception:
        pass
    safe_cap = int(0.75 * min(vmem_cap, 128 * 1024 * 1024))

    # --- column tile: keep the whole padded row (weight resident, fetched once)
    #     whenever it fits; otherwise fall back to a 128-multiple divisor of KOp.
    weight_resident_bytes = 2 * E * KOp * itemsize + 2 * 8 * KOp * 4
    if weight_resident_bytes <= safe_cap // 2:
        tn = KOp
    else:
        tn = 128
        cand = min(_round_up(max_col_tile, 128), KOp)
        cand = (cand // 128) * 128
        while cand >= 128:
            if KOp % cand == 0:
                tn = cand
                break
            cand -= 128

    # --- row tile: largest aligned tile that keeps double-buffered tokens + output
    #     tiles (plus the weight/bias tiles) inside the VMEM budget.
    remaining = safe_cap - (2 * E * tn * itemsize + 2 * 8 * tn * 4)
    per_row = 2 * E * itemsize + 2 * tn * out_itemsize
    tm_cap = max(row_align, (remaining // per_row // row_align) * row_align)
    tm = min(_round_up(max_row_tile, row_align), _round_up(M, row_align), tm_cap)

    n_row = -(-M // tm)
    # v7x megacore balance: prefer an even row-tile count when there is >1 tile.
    if n_row > 1 and n_row % 2 == 1:
        tm2 = _round_up(-(-M // (n_row + 1)), row_align)
        if row_align <= tm2 <= tm and (-(-M // tm2)) % 2 == 0:
            tm = tm2
            n_row = -(-M // tm)

    Mp = n_row * tm
    if Mp != M:
        x2 = jnp.pad(x2, ((0, Mp - M), (0, 0)))

    per_step = (2 * tm * E * itemsize          # tokens tile (double buffered)
                + 2 * E * tn * itemsize        # weight tile
                + 2 * 8 * tn * 4               # bias tile (padded to 8 sublanes)
                + 2 * tm * tn * out_itemsize)  # output tile
    vmem_limit = int(min(safe_cap, max(16 * 1024 * 1024, per_step + (4 << 20))))

    cost = pl.CostEstimate(
        flops=2 * Mp * E * KOp,
        transcendentals=0,
        bytes_accessed=(Mp * E * itemsize + E * KOp * itemsize
                        + KOp * 4 + Mp * KOp * out_itemsize),
    )

    if tn == KOp:
        # 1-D grid: weight/bias block indices are constant -> DMA'd once, stay resident.
        grid = (n_row,)
        in_specs = [
            pl.BlockSpec((tm, E), lambda i: (i, 0)),
            pl.BlockSpec((E, KOp), lambda i: (0, 0)),
            pl.BlockSpec((1, KOp), lambda i: (0, 0)),
        ]
        out_specs = pl.BlockSpec((tm, KOp), lambda i: (i, 0))
        dims = ("parallel",)
    else:
        # Fallback for very large weights: column-tiled, tokens resident across j.
        grid = (n_row, KOp // tn)
        in_specs = [
            pl.BlockSpec((tm, E), lambda i, j: (i, 0)),
            pl.BlockSpec((E, tn), lambda i, j: (0, j)),
            pl.BlockSpec((1, tn), lambda i, j: (0, j)),
        ]
        out_specs = pl.BlockSpec((tm, tn), lambda i, j: (i, j))
        dims = ("parallel", "parallel")

    out = pl.pallas_call(
        patch_deembed_kernel,
        out_shape=jax.ShapeDtypeStruct((Mp, KOp), out_dtype),
        grid=grid,
        in_specs=in_specs,
        out_specs=out_specs,
        compiler_params=pltpu.CompilerParams(
            dimension_semantics=dims,
            vmem_limit_bytes=vmem_limit,
        ),
        cost_estimate=cost,
    )(x2, w_de, b_de)

    # --- pure-layout rearrangement (XLA glue) back to NCHW.
    #     Column order within a row is (c, u, v), matching the ConvTranspose weight.
    out = out[:M, :KO].reshape(B, Hp, Wp, C, p, p)
    return out.transpose(0, 3, 1, 4, 2, 5).reshape(B, C, Hp * p, Wp * p)


# -------------------------------------------------------------------------------- main

if __name__ == "__main__":
    # Small config consistent with the module: batch=2, in_chans=4, img=16, patch=4, embed=32.
    B, C, img, p, E = 2, 4, 16, 4, 32
    Hp = Wp = img // p
    N = Hp * Wp

    key = jax.random.PRNGKey(0)
    kx, kw, kb = jax.random.split(key, 3)
    tokens = jax.random.normal(kx, (B, N, E), jnp.float32)
    w_conv = 0.05 * jax.random.normal(kw, (E, C, p, p), jnp.float32)  # ConvTranspose2d layout
    bias = 0.05 * jax.random.normal(kb, (C,), jnp.float32)

    w_de = w_conv.reshape(E, C * p * p)            # columns ordered (c, u, v)
    b_de = jnp.repeat(bias, p * p)[None, :]        # bias repeated per (u, v)

    out = patch_deembed(tokens, w_de, b_de, patch_size=p, img_size=img, in_chans=C)
    out = jax.block_until_ready(out)
    assert out.shape == (B, C, img, img), out.shape
    assert bool(jnp.all(jnp.isfinite(out)))

    # Reference: ConvTranspose2d with stride == kernel, computed directly in JAX.
    ref = jnp.einsum("bije,ecuv->bciujv", tokens.reshape(B, Hp, Wp, E), w_conv)
    ref = ref.reshape(B, C, img, img) + bias[None, :, None, None]
    assert bool(jnp.allclose(out, ref, atol=1e-4, rtol=1e-4)), \
        float(jnp.max(jnp.abs(out - ref)))

    print("KERNEL_OK")
</pallas_src>

<mosaic_0001>
module attributes {stable_mosaic.version = 11 : i64} {
  func.func @patch_deembed_kernel(%arg0: i32, %arg1: memref<32x32xf32, #tpu.memory_space<vmem>>, %arg2: memref<32x128xf32, #tpu.memory_space<vmem>>, %arg3: memref<1x128xf32, #tpu.memory_space<vmem>>, %arg4: memref<32x128xf32, #tpu.memory_space<vmem>>) attributes {dimension_semantics = [#tpu.dimension_semantics<parallel>], iteration_bounds = array<i64: 1>, scalar_prefetch = 0 : i64, scratch_operands = 0 : i64, tpu.core_type = #tpu.core_type<tc>, window_params = [{transform_indices = @transform_0, window_bounds = array<i64: 32, 32>}, {pipeline_mode = #tpu.pipeline_mode<synchronous>, transform_indices = @transform_1, window_bounds = array<i64: 32, 128>}, {pipeline_mode = #tpu.pipeline_mode<synchronous>, transform_indices = @transform_2, window_bounds = array<i64: 1, 128>}, {transform_indices = @transform_3, window_bounds = array<i64: 32, 128>}]} {
    %c0 = arith.constant 0 : index
    %c0_0 = arith.constant 0 : index
    %0 = vector.load %arg1[%c0, %c0_0] : memref<32x32xf32, #tpu.memory_space<vmem>>, vector<32x32xf32>
    %c0_1 = arith.constant 0 : index
    %c0_2 = arith.constant 0 : index
    %1 = vector.load %arg2[%c0_1, %c0_2] : memref<32x128xf32, #tpu.memory_space<vmem>>, vector<32x128xf32>
    %cst = arith.constant dense<0.000000e+00> : vector<32x128xf32>
    %2 = tpu.matmul %0, %1, %cst {dimension_numbers = #tpu.dot_dimension_numbers<[1], [0], [0], [1], [0, 0, 1, 1], [], []>} : vector<32x32xf32>, vector<32x128xf32>, vector<32x128xf32> -> vector<32x128xf32>
    %c0_3 = arith.constant 0 : index
    %c0_4 = arith.constant 0 : index
    %3 = vector.load %arg3[%c0_3, %c0_4] : memref<1x128xf32, #tpu.memory_space<vmem>>, vector<1x128xf32>
    %4 = vector.broadcast %3 : vector<1x128xf32> to vector<32x128xf32>
    %5 = arith.addf %2, %4 : vector<32x128xf32>
    %c0_5 = arith.constant 0 : index
    %c0_6 = arith.constant 0 : index
    %6 = vector.load %arg4[%c0_5, %c0_6] : memref<32x128xf32, #tpu.memory_space<vmem>>, vector<32x128xf32>
    tpu.vector_store %arg4[%c0_5, %c0_6], %5 {strides = array<i32>} : memref<32x128xf32, #tpu.memory_space<vmem>>, vector<32x128xf32>,
    return
  }
  func.func @transform_0(%arg0: i32) -> (i32, i32) {
    %c0_i32 = arith.constant 0 : i32
    %c0_i32_0 = arith.constant 0 : i32
    return %arg0, %c0_i32 : i32, i32
  }
  func.func @transform_1(%arg0: i32) -> (i32, i32) {
    %c0_i32 = arith.constant 0 : i32
    %c0_i32_0 = arith.constant 0 : i32
    %c0_i32_1 = arith.constant 0 : i32
    return %c0_i32, %c0_i32_0 : i32, i32
  }
  func.func @transform_2(%arg0: i32) -> (i32, i32) {
    %c0_i32 = arith.constant 0 : i32
    %c0_i32_0 = arith.constant 0 : i32
    %c0_i32_1 = arith.constant 0 : i32
    return %c0_i32, %c0_i32_0 : i32, i32
  }
  func.func @transform_3(%arg0: i32) -> (i32, i32) {
    %c0_i32 = arith.constant 0 : i32
    %c0_i32_0 = arith.constant 0 : i32
    return %arg0, %c0_i32 : i32, i32
  }
}

</mosaic_0001>

<bundles_post_ra>
// kernel: tpu_custom_call.1
= control target key start
LH: loop header
LB: loop body
LE: loop exit
PB: predicated region body
PF: predicated region fallthrough
CT: control target
= control target key end

     0   :  { %8 = vsyncpa [#allocation3], 0  ;;  %s371_s0 = inlined_call_operand.hbm [shape: f32[32,32], index: 0, kind: input, shape index: {}]   ;;  %s372_s1 = inlined_call_operand.hbm [shape: f32[32,128], index: 1, kind: input, shape index: {}]   ;;  %s373_s2 = inlined_call_operand.vmem [shape: f32[1,128], index: 2, kind: input, shape index: {}]   ;;  %s374_s3 = inlined_call_operand.hbm [shape: f32[32,128], index: 3, kind: output, shape index: {}]  }
   0x1   :  { %9 = vsyncpa [#allocation6], 0 }
   0x2   :  { %10 = vsyncpa [#allocation4], 0  ;;  %s294_s12 = smov [#allocation2]   ;;  %s222_s16 = scalar_lea.hbm %s371_s0, 512 }
   0x3   :  { %s16_s13 = sshll.u32 %s294_s12, 4  ;;  %p223_p0 = scmp.ne.s32.totalorder %s371_s0, %s222_s16  ;;  %s17_s13 = int_to_ptr.vmem [resolvable:$true] %s16_s13 }
   0x4   :  { %p226_p1 = scmp.lt.u32.totalorder %s222_s16, %s371_s0 }
   0x6   :  { %p228_p2 = pnand %p226_p1, %p223_p0 }
   0x8   :  { %231 = shalt.err (!%p228_p2)
}
   0x9   :  { %s232_s21 = scalar_lea.vmem %s17_s13, 512  ;;  %p237_p4 = scmp.lt.s32.totalorder %s17_s13, %s17_s13 }
   0xa   :  { %p233_p3 = scmp.ne.s32.totalorder %s17_s13, %s232_s21  ;;  %p238_p5 = scmp.lt.s32.totalorder %s232_s21, %s232_s21 }
   0xc   :  { %p239_p6 = por %p238_p5, %p237_p4 }
   0xe   :  { %p240_p7 = pnand %p239_p6, %p233_p3 }
  0x10   :  { %243 = shalt.err (!%p240_p7)
}
  0x11   :  { %s295_s22 = smov 128   ;;  %s296_s23 = smov 8  }
  0x12   :  { %22 = dma.hbm_to_vmem [thread:$0]  %s371_s0, 512, %s17_s13, [#allocation3], %s295_s22, %s295_s22, %s296_s23  }
  0x13   :  { %s297_s26 = smov [#allocation5]   ;;  %s244_s30 = scalar_lea.hbm %s372_s1, 512 }
  0x14   :  { %s28_s27 = sshll.u32 %s297_s26, 4  ;;  %p245_p8 = scmp.ne.s32.totalorder %s372_s1, %s244_s30  ;;  %s29_s27 = int_to_ptr.vmem [resolvable:$true] %s28_s27 }
  0x15   :  { %p248_p9 = scmp.lt.u32.totalorder %s244_s30, %s372_s1 }
  0x17   :  { %p250_p10 = pnand %p248_p9, %p245_p8 }
  0x19   :  { %253 = shalt.err (!%p250_p10)
}
  0x1a   :  { %s254_s8 = scalar_lea.vmem %s29_s27, 512  ;;  %p259_p12 = scmp.lt.s32.totalorder %s29_s27, %s29_s27 }
  0x1b   :  { %p255_p11 = scmp.ne.s32.totalorder %s29_s27, %s254_s8  ;;  %p260_p13 = scmp.lt.s32.totalorder %s254_s8, %s254_s8 }
  0x1d   :  { %p261_p0 = por %p260_p13, %p259_p12 }
  0x1f   :  { %p262_p1 = pnand %p261_p0, %p255_p11 }
  0x21   :  { %265 = shalt.err (!%p262_p1)
}
  0x22   :  { %34 = dma.hbm_to_vmem [thread:$0]  %s372_s1, 512, %s29_s27, [#allocation6], %s295_s22, %s295_s22, %s296_s23  }
  0x23   :  { %288 = dma.done.wait [#allocation3], 512  }
  0x24   :  { %289 = vsyncadd [#allocation3], 4294966784 }
  0x25   :  { %290 = dma.done.wait [#allocation6], 512  }
  0x26   :  { %291 = vsyncadd [#allocation6], 4294966784  ;;  %vm58_vm0 = vcmask 261120   ;;  %v47_v0 = vld [vmem:[#allocation5] sm:$0xff]  ;;  %v48_v1 = vld [vmem:[#allocation5 + $0x8] sm:$0xff]  ;;  %s298_s11 = smov [#allocation7]  }
  0x27   :  { %v49_v2 = vld [vmem:[#allocation5 + $0x10] sm:$0xff]  ;;  %v205_v3 = vpack.c.bf16 %v48_v1, %v47_v0  ;;  %v50_v4 = vld [vmem:[#allocation5 + $0x18] sm:$0xff]  ;;  %v43_v5 = vld [vmem:[#allocation2] sm:$0xff]  ;;  %s165_s12 = sshll.u32 %s298_s11, 4  ;;  %s166_s12 = int_to_ptr.vmem [resolvable:$true] %s165_s12 }
  0x28   :  { %v45_v6 = vld [vmem:[#allocation2 + $0x10] sm:$0xff]  ;;  %v209_v7 = vpack.c.bf16 %v50_v4, %v49_v2  ;;  %199 = vmatprep.mubr.msk.f32.mxu0 %vm58_vm0, %v43_v5  ;;  %v44_v8 = vld [vmem:[#allocation2 + $0x8] sm:$0xff]  ;;  %v46_v9 = vld [vmem:[#allocation2 + $0x18] sm:$0xff]  ;;  %s266_s13 = scalar_lea.vmem %s166_s12, 512  ;;  %p271_p3 = scmp.lt.s32.totalorder %s166_s12, %s166_s12 }
  0x29   :  { %202 = vmatprep.mubr.msk.f32.mxu1 %vm58_vm0, %v45_v6  ;;  %206 = vmatprep.subr.bf16.mxu0 %v205_v3  ;;  %v178_v10 = vld [vmem:[%s373_s2] ss:$0 sm:$0xff]  ;;  %p267_p2 = scmp.ne.s32.totalorder %s166_s12, %s266_s13  ;;  %p272_p4 = scmp.lt.s32.totalorder %s266_s13, %s266_s13 }
  0x2a   :  { %213 = vmatprep.subr.bf16.mxu1 %v205_v3  ;;  %208 = vmatpush3.bf16.msra.mxu0 %v205_v3 }
  0x2b   :  { %215 = vmatpush3.bf16.msra.mxu1 %v205_v3  ;;  %210 = vmatprep.subr.bf16.mxu0 %v209_v7  ;;  %p273_p5 = por %p272_p4, %p271_p3 }
  0x2c   :  { %214 = vmatprep.subr.bf16.mxu1 %v209_v7 }
  0x2d   :  { %p274_p6 = pnand %p273_p5, %p267_p2 }
  0x2e   :  { %212 = vmatpush3.bf16.msra.mxu0 %v209_v7 }
  0x2f   :  { %216 = vmatpush3.bf16.msra.mxu1 %v209_v7 }
  0x31   :  { %200 = vmatmul.mubr.msk.f32.vlgmr.msra.gmra.mrb[0].mxu0 %vm58_vm0, %v44_v8 }
  0x32   :  { %203 = vmatmul.mubr.msk.f32.vlgmr.msra.gmra.mrb[0].mxu1 %vm58_vm0, %v46_v9 }
 0x104   :  { %v201_v11 = vpop.f32.mrb[0].mxu0 }
 0x105   :  { %v204_v12 = vpop.f32.mrb[0].mxu1  ;;  %v143_v13 = vadd.f32 %v201_v11, %v178_v10  ;;  %v137_v15 = vpop.f32.mrb[1].mxu0 }
 0x106   :  { %v153_v14 = vadd.f32 %v204_v12, %v178_v10  ;;  %v147_v16 = vpop.f32.mrb[1].mxu1  ;;  %v138_v17 = vadd.f32 %v178_v10, %v137_v15 }
 0x107   :  { %v148_v18 = vadd.f32 %v178_v10, %v147_v16  ;;  %157 = vst [vmem:[#allocation7 + $0x8] sm:$0xff] %v143_v13 }
 0x108   :  { %159 = vst [vmem:[#allocation7 + $0x18] sm:$0xff] %v153_v14  ;;  %156 = vst [vmem:[#allocation7] sm:$0xff] %v138_v17 }
 0x109   :  { %158 = vst [vmem:[#allocation7 + $0x10] sm:$0xff] %v148_v18 }
 0x10a   :  { %277 = shalt.err (!%p274_p6)
}
 0x10b   :  { %s278_s15 = scalar_lea.hbm %s374_s3, 512 }
 0x10c   :  { %p279_p7 = scmp.ne.s32.totalorder %s374_s3, %s278_s15  ;;  %p282_p8 = scmp.lt.u32.totalorder %s278_s15, %s374_s3 }
 0x10e   :  { %p284_p9 = pnand %p282_p8, %p279_p7 }
 0x110   :  { %287 = shalt.err (!%p284_p9)
}
 0x111   :  { %171 = dma.vmem_to_hbm [thread:$0]  %s166_s12, 512, %s374_s3, [#allocation4], %s295_s22, %s295_s22, %s296_s23  }
 0x112   :  { %292 = dma.done.wait [#allocation4], 512  }
 0x113   :  { %293 = vsyncadd [#allocation4], 4294966784 }
 0x114   :  { %175 = vsyncpa [#allocation3], 1 }
 0x115   :  { %176 = vsyncpa [#allocation6], 1 }
 0x116   :  { %177 = vsyncpa [#allocation4], 1 }

</bundles_post_ra>
